<compile_context>
chip_gen: v6e
topology: v6e:2x2x1
jax: 0.10.0
libtpu: 0.0.40
codegen_flags: <defaults>
</compile_context>

<pallas_src>
import jax
import jax.numpy as jnp
import numpy as np
from jax.experimental import pallas as pl
from jax.experimental.pallas import tpu as pltpu


def _round_up(x, m):
    return (x + m - 1) // m * m


def _make_dgi2_kernel(has_bias, tm, hp, n_rows):
    """Kernel factory. tm = adj row tile, hp = padded hidden, n_rows = padded N."""

    def kernel(scal_ref, seq_ref, adj_ref, msk_ref, wfc_ref, bgcn_ref, wbl_ref, *rest):
        if has_bias:
            sb_ref, out_ref, fts_ref, h_ref, msum_ref = rest
        else:
            out_ref, fts_ref, h_ref, msum_ref = rest
            sb_ref = None

        t = pl.program_id(1)
        alpha = scal_ref[0]        # PReLU slope           (SMEM scalar)
        b_bl = scal_ref[1]         # bilinear bias         (SMEM scalar)
        inv_msum = scal_ref[2]     # 1 / sum(msk)          (SMEM scalar)

        # ---- per-batch prologue: ONE stacked fts matmul for both views -------
        @pl.when(t == 0)
        def _():
            fts = jnp.dot(seq_ref[...], wfc_ref[...],
                          preferred_element_type=jnp.float32)            # (2N, Hp)
            fts_ref[:, :hp] = fts[:n_rows, :].astype(fts_ref.dtype)      # view 1
            fts_ref[:, hp:] = fts[n_rows:, :].astype(fts_ref.dtype)      # view 2
            msum_ref[...] = jnp.zeros_like(msum_ref)

        # ---- GCN aggregate for this adjacency row tile (single adj pass) -----
        hz = jnp.dot(adj_ref[...], fts_ref[...],
                     preferred_element_type=jnp.float32)                 # (tm, 2Hp)
        hz = hz + bgcn_ref[...]                                          # (1, 2Hp) bcast
        h_t = jnp.where(hz > 0, hz, alpha * hz)                          # PReLU
        row0 = pl.multiple_of(t * tm, 8)
        h_ref[pl.ds(row0, tm), :] = h_t                                  # keep rows for epilogue

        # masked AvgReadout partial sum as an MXU matvec: (1, tm) @ (tm, Hp)
        msum_ref[...] += jnp.dot(msk_ref[...], h_t[:, :hp],
                                 preferred_element_type=jnp.float32)

        # ---- per-batch epilogue: summary, bilinear scores, lane-dense out ----
        @pl.when(t == pl.num_programs(1) - 1)
        def _():
            c = jax.nn.sigmoid(msum_ref[...] * inv_msum)                 # (1, Hp)
            # wc[i] = sum_j W_bl[i, j] * c[j], kept as a lane-dense row.
            wc = jax.lax.dot_general(c, wbl_ref[...],
                                     (((1,), (1,)), ((), ())),
                                     preferred_element_type=jnp.float32)  # (1, Hp)
            h1 = h_ref[:, :hp]                                            # (Np, Hp)
            h2 = h_ref[:, hp:]                                            # (Np, Hp)
            # sc_i = h_i @ wc, computed contract-last so the result is a
            # lane-dense (1, Np) row -> unmasked stores into the (2, Np) output.
            sc1 = jax.lax.dot_general(wc, h1, (((1,), (1,)), ((), ())),
                                      preferred_element_type=jnp.float32) + b_bl
            sc2 = jax.lax.dot_general(wc, h2, (((1,), (1,)), ((), ())),
                                      preferred_element_type=jnp.float32) + b_bl
            if sb_ref is not None:
                sc1 = sc1 + sb_ref[0:1, :]
                sc2 = sc2 + sb_ref[1:2, :]
            out_ref[0:1, :] = sc1
            out_ref[1:2, :] = sc2

    return kernel


def dgi2_forward(params, seq1, seq2, adj, msk=None, samp_bias1=None, samp_bias2=None,
                 *, row_tile=256, matmul_dtype=jnp.float32):
    """DGI2 forward (dense-adjacency path). Returns logits (B, 2N)."""
    B, N, Fin = seq1.shape
    H = params["w_fc"].shape[0]
    f32 = jnp.float32

    # --- padded, lane-dense geometry ------------------------------------------
    Hp = max(_round_up(H, 128), 128)
    Finp = max(_round_up(Fin, 128), 128)
    if N <= row_tile:
        Np = _round_up(N, 8)
        tm = Np                       # single row tile per batch
    else:
        tm = _round_up(row_tile, 128)  # lane tile for the mask blocks
        Np = _round_up(N, tm)
    ntiles = Np // tm

    # --- parameters (zero-padded; padding provably doesn't change results) ----
    wfc = jnp.asarray(params["w_fc"], f32)                                # (H, Fin)
    wfc_t = jnp.zeros((Finp, Hp), f32).at[:Fin, :H].set(wfc.T)
    bgcn = jnp.zeros((1, Hp), f32).at[0, :H].set(jnp.asarray(params["b_gcn"], f32))
    bgcn2 = jnp.concatenate([bgcn, bgcn], axis=1)                         # bias for both views
    wbl = jnp.zeros((Hp, Hp), f32).at[:H, :H].set(
        jnp.asarray(params["w_bl"], f32).reshape(H, H))
    alpha = jnp.asarray(params["prelu_alpha"], f32).reshape(())
    bbl = jnp.asarray(params["b_bl"], f32).reshape(())

    # --- mask + readout normalizer (torch.sum(msk) is a GLOBAL sum) -----------
    if msk is None:
        msk_f = jnp.ones((B, N), f32)
        inv_msum = jnp.asarray(1.0 / N, f32)          # AvgReadout falls back to mean over nodes
    else:
        msk_f = jnp.asarray(msk, f32)
        inv_msum = 1.0 / jnp.sum(msk_f)               # caller must supply a non-empty mask
    msk_row = jnp.zeros((B, 1, Np), f32).at[:, 0, :N].set(msk_f)          # lane-dense mask

    # --- inputs: both views stacked along nodes -> one fts matmul -------------
    def _pad_seq(s):
        return jnp.zeros((B, Np, Finp), matmul_dtype).at[:, :N, :Fin].set(
            jnp.asarray(s, matmul_dtype))

    seq_cat = jnp.concatenate([_pad_seq(seq1), _pad_seq(seq2)], axis=1)   # (B, 2Np, Finp)
    adj_p = jnp.zeros((B, Np, Np), matmul_dtype).at[:, :N, :N].set(
        jnp.asarray(adj, matmul_dtype))
    wfc_c = wfc_t.astype(matmul_dtype)

    scalars = jnp.stack([alpha, bbl, inv_msum]).astype(f32)               # (3,) -> SMEM

    has_bias = (samp_bias1 is not None) or (samp_bias2 is not None)

    in_specs = [
        pl.BlockSpec(memory_space=pltpu.MemorySpace.SMEM),                # scalars
        pl.BlockSpec((None, 2 * Np, Finp), lambda b, t: (b, 0, 0)),       # stacked seq (per batch)
        pl.BlockSpec((None, tm, Np), lambda b, t: (b, t, 0)),             # adj row tile
        pl.BlockSpec((None, 1, tm), lambda b, t: (b, 0, t)),              # mask row tile
        pl.BlockSpec((Finp, Hp), lambda b, t: (0, 0)),                    # W_fc^T (padded)
        pl.BlockSpec((1, 2 * Hp), lambda b, t: (0, 0)),                   # GCN bias, both views
        pl.BlockSpec((Hp, Hp), lambda b, t: (0, 0)),                      # bilinear W
    ]
    args = [scalars, seq_cat, adj_p, msk_row, wfc_c, bgcn2, wbl]
    if has_bias:
        sb1 = (jnp.zeros((B, N), f32) if samp_bias1 is None
               else jnp.asarray(samp_bias1, f32).reshape(B, N))
        sb2 = (jnp.zeros((B, N), f32) if samp_bias2 is None
               else jnp.asarray(samp_bias2, f32).reshape(B, N))
        sb = jnp.zeros((B, 2, Np), f32).at[:, 0, :N].set(sb1).at[:, 1, :N].set(sb2)
        in_specs.append(pl.BlockSpec((None, 2, Np), lambda b, t: (b, 0, 0)))
        args.append(sb)
    # else: samp_bias DMAs are skipped entirely (no zero tensors streamed).

    out_spec = pl.BlockSpec((None, 2, Np), lambda b, t: (b, 0, 0))        # lane-dense scores

    scratch = [
        pltpu.VMEM((Np, 2 * Hp), matmul_dtype),   # fts for both views (resident per batch)
        pltpu.VMEM((Np, 2 * Hp), f32),            # h1 | h2 rows (needed by the epilogue)
        pltpu.VMEM((1, Hp), f32),                 # masked-readout partial sum
    ]

    # VMEM budget: double-buffered adj/seq tiles + resident scratch (+ headroom).
    # NOTE: on v7x (64 MiB VMEM) pick a smaller row_tile for large N so this fits.
    itm = jnp.dtype(matmul_dtype).itemsize
    est = (2 * tm * Np * itm                      # adj tile, double-buffered
           + 2 * 2 * Np * Finp * itm              # stacked seq, double-buffered
           + Np * 2 * Hp * (itm + 4)              # fts + h scratch
           + (Finp * Hp + Hp * Hp + 3 * Hp) * 4   # weights / bias
           + 16 * Np * 4                          # out / mask / bias blocks
           + (2 << 20))                           # headroom
    vmem_limit = int(min(max(2 * est, 32 << 20), 100 << 20))

    out = pl.pallas_call(
        _make_dgi2_kernel(has_bias, tm, Hp, Np),
        out_shape=jax.ShapeDtypeStruct((B, 2, Np), f32),
        grid=(B, ntiles),
        in_specs=in_specs,
        out_specs=out_spec,
        scratch_shapes=scratch,
        compiler_params=pltpu.CompilerParams(
            # batch axis can be megacore-sharded; row-tile axis carries scratch state.
            dimension_semantics=("parallel", "arbitrary"),
            vmem_limit_bytes=vmem_limit),
    )(*args)

    # (B, 2, Np) rows are [sc_1, sc_2]  ->  torch.cat((sc_1, sc_2), dim=1)
    return out[:, :, :N].reshape(B, 2 * N)


def dgi2_reference(params, seq1, seq2, adj, msk, samp_bias1=None, samp_bias2=None):
    """Pure-JAX reference mirroring the PyTorch forward."""
    wfc = params["w_fc"]
    b = params["b_gcn"]
    a = params["prelu_alpha"]
    H = wfc.shape[0]
    wbl = params["w_bl"].reshape(H, H)
    bbl = params["b_bl"]

    def gcn(seq):
        fts = seq @ wfc.T
        out = jnp.einsum('bij,bjh->bih', adj, fts) + b
        return jnp.where(out > 0, out, a * out)

    h1 = gcn(seq1)
    h2 = gcn(seq2)
    m = msk[..., None]
    c = jnp.sum(h1 * m, axis=1) / jnp.sum(m)
    c = jax.nn.sigmoid(c)
    sc1 = jnp.einsum('bnh,hk,bk->bn', h1, wbl, c) + bbl
    sc2 = jnp.einsum('bnh,hk,bk->bn', h2, wbl, c) + bbl
    if samp_bias1 is not None:
        sc1 = sc1 + samp_bias1
    if samp_bias2 is not None:
        sc2 = sc2 + samp_bias2
    return jnp.concatenate([sc1, sc2], axis=1)


def _make_inputs(key, B, N, Fin, H):
    ks = jax.random.split(key, 8)
    seq1 = jax.random.normal(ks[0], (B, N, Fin), jnp.float32)
    seq2 = jax.random.normal(ks[1], (B, N, Fin), jnp.float32)
    # Dense row-normalized adjacency with self loops (sparse=False path).
    a = (jax.random.uniform(ks[2], (B, N, N)) < 0.3).astype(jnp.float32)
    a = jnp.maximum(a, jnp.transpose(a, (0, 2, 1))) + jnp.eye(N, dtype=jnp.float32)[None]
    adj = a / jnp.sum(a, axis=-1, keepdims=True)
    msk = (jax.random.uniform(ks[3], (B, N)) < 0.8).astype(jnp.float32)
    msk = msk.at[:, 0].set(1.0)   # guarantee non-empty mask
    params = {
        "w_fc": 0.1 * jax.random.normal(ks[4], (H, Fin), jnp.float32),    # nn.Linear(n_in,n_h,bias=False)
        "b_gcn": jnp.zeros((H,), jnp.float32),                            # GCN bias init fill_(0.0)
        "prelu_alpha": jnp.array(0.25, jnp.float32),                      # nn.PReLU default
        "w_bl": 0.1 * jax.random.normal(ks[5], (1, H, H), jnp.float32),   # nn.Bilinear(n_h,n_h,1)
        "b_bl": jnp.zeros((1,), jnp.float32),
    }
    sb1 = 0.1 * jax.random.normal(ks[6], (B, N), jnp.float32)
    sb2 = 0.1 * jax.random.normal(ks[7], (B, N), jnp.float32)
    return params, seq1, seq2, adj, msk, sb1, sb2


if __name__ == "__main__":
    key = jax.random.PRNGKey(0)
    k1, k2 = jax.random.split(key)

    # Config 1: tiny shapes, single row tile, f32 MXU path, with samp_bias.
    B, N, Fin, H = 2, 16, 8, 32
    p, s1, s2, adj, msk, sb1, sb2 = _make_inputs(k1, B, N, Fin, H)
    logits = jax.block_until_ready(dgi2_forward(p, s1, s2, adj, msk, sb1, sb2))
    ref = dgi2_reference(p, s1, s2, adj, msk, sb1, sb2)
    np.testing.assert_allclose(np.asarray(logits), np.asarray(ref), rtol=5e-4, atol=5e-4)
    assert logits.shape == (B, 2 * N)

    # Config 2: multi-row-tile grid (N > row_tile), bf16 MXU path, no samp_bias.
    B2, N2 = 2, 320
    p, s1, s2, adj, msk, _, _ = _make_inputs(k2, B2, N2, Fin, H)
    logits2 = jax.block_until_ready(
        dgi2_forward(p, s1, s2, adj, msk, None, None,
                     row_tile=128, matmul_dtype=jnp.bfloat16))
    ref2 = dgi2_reference(p, s1, s2, adj, msk)
    np.testing.assert_allclose(np.asarray(logits2), np.asarray(ref2), rtol=5e-2, atol=1e-2)
    assert logits2.shape == (B2, 2 * N2)

    print("KERNEL_OK")
</pallas_src>

<mosaic_0001>
module attributes {stable_mosaic.version = 11 : i64} {
  func.func @kernel(%arg0: i32, %arg1: i32, %arg2: memref<3xf32, #tpu.memory_space<smem>>, %arg3: memref<1x32x128xf32, #tpu.memory_space<vmem>>, %arg4: memref<1x16x16xf32, #tpu.memory_space<vmem>>, %arg5: memref<1x1x16xf32, #tpu.memory_space<vmem>>, %arg6: memref<128x128xf32, #tpu.memory_space<vmem>>, %arg7: memref<1x256xf32, #tpu.memory_space<vmem>>, %arg8: memref<128x128xf32, #tpu.memory_space<vmem>>, %arg9: memref<1x2x16xf32, #tpu.memory_space<vmem>>, %arg10: memref<1x2x16xf32, #tpu.memory_space<vmem>>, %arg11: memref<16x256xf32, #tpu.memory_space<vmem>>, %arg12: memref<16x256xf32, #tpu.memory_space<vmem>>, %arg13: memref<1x128xf32, #tpu.memory_space<vmem>>) attributes {dimension_semantics = [#tpu.dimension_semantics<parallel>, #tpu.dimension_semantics<arbitrary>], iteration_bounds = array<i64: 2, 1>, scalar_prefetch = 0 : i64, scratch_operands = 3 : i64, tpu.core_type = #tpu.core_type<tc>, window_params = [{transform_indices = @transform_0, window_bounds = array<i64: 3>}, {transform_indices = @transform_1, window_bounds = array<i64: 1, 32, 128>}, {transform_indices = @transform_2, window_bounds = array<i64: 1, 16, 16>}, {transform_indices = @transform_3, window_bounds = array<i64: 1, 1, 16>}, {pipeline_mode = #tpu.pipeline_mode<synchronous>, transform_indices = @transform_4, window_bounds = array<i64: 128, 128>}, {pipeline_mode = #tpu.pipeline_mode<synchronous>, transform_indices = @transform_5, window_bounds = array<i64: 1, 256>}, {pipeline_mode = #tpu.pipeline_mode<synchronous>, transform_indices = @transform_6, window_bounds = array<i64: 128, 128>}, {transform_indices = @transform_7, window_bounds = array<i64: 1, 2, 16>}, {transform_indices = @transform_8, window_bounds = array<i64: 1, 2, 16>}]} {
    %c0 = arith.constant 0 : index
    %0 = memref.load %arg2[%c0] : memref<3xf32, #tpu.memory_space<smem>>
    %c1 = arith.constant 1 : index
    %1 = memref.load %arg2[%c1] : memref<3xf32, #tpu.memory_space<smem>>
    %c2 = arith.constant 2 : index
    %2 = memref.load %arg2[%c2] : memref<3xf32, #tpu.memory_space<smem>>
    %c0_i32 = arith.constant 0 : i32
    %3 = arith.cmpi eq, %arg1, %c0_i32 : i32
    %4 = arith.extui %3 : i1 to i32
    %c0_i32_0 = arith.constant 0 : i32
    %5 = arith.cmpi ne, %4, %c0_i32_0 : i32
    scf.if %5 {
      %c0_20 = arith.constant 0 : index
      %c0_21 = arith.constant 0 : index
      %c0_22 = arith.constant 0 : index
      %32 = vector.load %arg3[%c0_20, %c0_21, %c0_22] : memref<1x32x128xf32, #tpu.memory_space<vmem>>, vector<1x32x128xf32>
      %33 = vector.shape_cast %32 : vector<1x32x128xf32> to vector<32x128xf32>
      %c0_23 = arith.constant 0 : index
      %c0_24 = arith.constant 0 : index
      %34 = vector.load %arg6[%c0_23, %c0_24] : memref<128x128xf32, #tpu.memory_space<vmem>>, vector<128x128xf32>
      %cst_25 = arith.constant dense<0.000000e+00> : vector<32x128xf32>
      %35 = tpu.matmul %33, %34, %cst_25 {dimension_numbers = #tpu.dot_dimension_numbers<[1], [0], [0], [1], [0, 0, 1, 1], [], []>} : vector<32x128xf32>, vector<128x128xf32>, vector<32x128xf32> -> vector<32x128xf32>
      %36 = vector.extract_strided_slice %35 {offsets = [0, 0], sizes = [16, 128], strides = [1, 1]} : vector<32x128xf32> to vector<16x128xf32>
      %c0_26 = arith.constant 0 : index
      %c0_27 = arith.constant 0 : index
      %37 = vector.load %arg11[%c0_26, %c0_27] : memref<16x256xf32, #tpu.memory_space<vmem>>, vector<16x128xf32>
      tpu.vector_store %arg11[%c0_26, %c0_27], %36 {strides = array<i32>} : memref<16x256xf32, #tpu.memory_space<vmem>>, vector<16x128xf32>,
      %38 = vector.extract_strided_slice %35 {offsets = [16, 0], sizes = [16, 128], strides = [1, 1]} : vector<32x128xf32> to vector<16x128xf32>
      %c0_28 = arith.constant 0 : index
      %c128 = arith.constant 128 : index
      %39 = vector.load %arg11[%c0_28, %c128] : memref<16x256xf32, #tpu.memory_space<vmem>>, vector<16x128xf32>
      tpu.vector_store %arg11[%c0_28, %c128], %38 {strides = array<i32>} : memref<16x256xf32, #tpu.memory_space<vmem>>, vector<16x128xf32>,
      %cst_29 = arith.constant 0.000000e+00 : f32
      %40 = vector.broadcast %cst_29 : f32 to vector<1x128xf32>
      %c0_30 = arith.constant 0 : index
      %c0_31 = arith.constant 0 : index
      %41 = vector.load %arg13[%c0_30, %c0_31] : memref<1x128xf32, #tpu.memory_space<vmem>>, vector<1x128xf32>
      tpu.vector_store %arg13[%c0_30, %c0_31], %40 {strides = array<i32>} : memref<1x128xf32, #tpu.memory_space<vmem>>, vector<1x128xf32>,
    } else {
    }
    %c0_1 = arith.constant 0 : index
    %c0_2 = arith.constant 0 : index
    %c0_3 = arith.constant 0 : index
    %6 = vector.load %arg4[%c0_1, %c0_2, %c0_3] : memref<1x16x16xf32, #tpu.memory_space<vmem>>, vector<1x16x16xf32>
    %7 = vector.shape_cast %6 : vector<1x16x16xf32> to vector<16x16xf32>
    %c0_4 = arith.constant 0 : index
    %c0_5 = arith.constant 0 : index
    %8 = vector.load %arg11[%c0_4, %c0_5] : memref<16x256xf32, #tpu.memory_space<vmem>>, vector<16x256xf32>
    %cst = arith.constant dense<0.000000e+00> : vector<16x256xf32>
    %9 = tpu.matmul %7, %8, %cst {dimension_numbers = #tpu.dot_dimension_numbers<[1], [0], [0], [1], [0, 0, 1, 1], [], []>} : vector<16x16xf32>, vector<16x256xf32>, vector<16x256xf32> -> vector<16x256xf32>
    %c0_6 = arith.constant 0 : index
    %c0_7 = arith.constant 0 : index
    %10 = vector.load %arg7[%c0_6, %c0_7] : memref<1x256xf32, #tpu.memory_space<vmem>>, vector<1x256xf32>
    %11 = vector.broadcast %10 : vector<1x256xf32> to vector<16x256xf32>
    %12 = arith.addf %9, %11 : vector<16x256xf32>
    %cst_8 = arith.constant 0.000000e+00 : f32
    %13 = vector.broadcast %cst_8 : f32 to vector<16x256xf32>
    %14 = arith.cmpf ogt, %12, %13 : vector<16x256xf32>
    %15 = vector.broadcast %0 : f32 to vector<16x256xf32>
    %16 = arith.mulf %15, %12 : vector<16x256xf32>
    %17 = arith.select %14, %12, %16 : vector<16x256xi1>, vector<16x256xf32>
    %c16_i32 = arith.constant 16 : i32
    %18 = arith.muli %arg1, %c16_i32 : i32
    %19 = tpu.assume_multiple %18, 8 : i32
    %20 = arith.index_cast %19 : i32 to index
    %c0_9 = arith.constant 0 : index
    %21 = vector.load %arg12[%20, %c0_9] : memref<16x256xf32, #tpu.memory_space<vmem>>, vector<16x256xf32>
    tpu.vector_store %arg12[%20, %c0_9], %17 {strides = array<i32>} : memref<16x256xf32, #tpu.memory_space<vmem>>, vector<16x256xf32>,
    %c0_10 = arith.constant 0 : index
    %c0_11 = arith.constant 0 : index
    %22 = vector.load %arg13[%c0_10, %c0_11] : memref<1x128xf32, #tpu.memory_space<vmem>>, vector<1x128xf32>
    %c0_12 = arith.constant 0 : index
    %c0_13 = arith.constant 0 : index
    %c0_14 = arith.constant 0 : index
    %23 = vector.load %arg5[%c0_12, %c0_13, %c0_14] : memref<1x1x16xf32, #tpu.memory_space<vmem>>, vector<1x1x16xf32>
    %24 = vector.shape_cast %23 : vector<1x1x16xf32> to vector<1x16xf32>
    %25 = vector.extract_strided_slice %17 {offsets = [0, 0], sizes = [16, 128], strides = [1, 1]} : vector<16x256xf32> to vector<16x128xf32>
    %cst_15 = arith.constant dense<0.000000e+00> : vector<1x128xf32>
    %26 = tpu.matmul %24, %25, %cst_15 {dimension_numbers = #tpu.dot_dimension_numbers<[1], [0], [0], [1], [0, 0, 1, 1], [], []>} : vector<1x16xf32>, vector<16x128xf32>, vector<1x128xf32> -> vector<1x128xf32>
    %27 = arith.addf %22, %26 : vector<1x128xf32>
    %c0_16 = arith.constant 0 : index
    %c0_17 = arith.constant 0 : index
    %28 = vector.load %arg13[%c0_16, %c0_17] : memref<1x128xf32, #tpu.memory_space<vmem>>, vector<1x128xf32>
    tpu.vector_store %arg13[%c0_16, %c0_17], %27 {strides = array<i32>} : memref<1x128xf32, #tpu.memory_space<vmem>>, vector<1x128xf32>,
    %c0_i32_18 = arith.constant 0 : i32
    %29 = arith.cmpi eq, %arg1, %c0_i32_18 : i32
    %30 = arith.extui %29 : i1 to i32
    %c0_i32_19 = arith.constant 0 : i32
    %31 = arith.cmpi ne, %30, %c0_i32_19 : i32
    scf.if %31 {
      %c0_20 = arith.constant 0 : index
      %c0_21 = arith.constant 0 : index
      %32 = vector.load %arg13[%c0_20, %c0_21] : memref<1x128xf32, #tpu.memory_space<vmem>>, vector<1x128xf32>
      %33 = vector.broadcast %2 : f32 to vector<1x128xf32>
      %34 = arith.mulf %32, %33 : vector<1x128xf32>
      %35 = arith.negf %34 : vector<1x128xf32>
      %36 = math.exp %35 : vector<1x128xf32>
      %cst_22 = arith.constant 1.000000e+00 : f32
      %37 = vector.broadcast %cst_22 : f32 to vector<1x128xf32>
      %38 = arith.addf %37, %36 : vector<1x128xf32>
      %39 = arith.divf %37, %38 : vector<1x128xf32>
      %c0_23 = arith.constant 0 : index
      %c0_24 = arith.constant 0 : index
      %40 = vector.load %arg8[%c0_23, %c0_24] : memref<128x128xf32, #tpu.memory_space<vmem>>, vector<128x128xf32>
      %cst_25 = arith.constant dense<0.000000e+00> : vector<1x128xf32>
      %41 = tpu.matmul %39, %40, %cst_25 {dimension_numbers = #tpu.dot_dimension_numbers<[1], [1], [0], [0], [0, 0, 1, 0], [], []>} : vector<1x128xf32>, vector<128x128xf32>, vector<1x128xf32> -> vector<1x128xf32>
      %c0_26 = arith.constant 0 : index
      %c0_27 = arith.constant 0 : index
      %42 = vector.load %arg12[%c0_26, %c0_27] : memref<16x256xf32, #tpu.memory_space<vmem>>, vector<16x128xf32>
      %c0_28 = arith.constant 0 : index
      %c128 = arith.constant 128 : index
      %43 = vector.load %arg12[%c0_28, %c128] : memref<16x256xf32, #tpu.memory_space<vmem>>, vector<16x128xf32>
      %cst_29 = arith.constant dense<0.000000e+00> : vector<1x16xf32>
      %44 = tpu.matmul %41, %42, %cst_29 {dimension_numbers = #tpu.dot_dimension_numbers<[1], [1], [0], [0], [0, 0, 1, 0], [], []>} : vector<1x128xf32>, vector<16x128xf32>, vector<1x16xf32> -> vector<1x16xf32>
      %45 = vector.broadcast %1 : f32 to vector<1x16xf32>
      %46 = arith.addf %44, %45 : vector<1x16xf32>
      %cst_30 = arith.constant dense<0.000000e+00> : vector<1x16xf32>
      %47 = tpu.matmul %41, %43, %cst_30 {dimension_numbers = #tpu.dot_dimension_numbers<[1], [1], [0], [0], [0, 0, 1, 0], [], []>} : vector<1x128xf32>, vector<16x128xf32>, vector<1x16xf32> -> vector<1x16xf32>
      %48 = vector.broadcast %1 : f32 to vector<1x16xf32>
      %49 = arith.addf %47, %48 : vector<1x16xf32>
      %c0_31 = arith.constant 0 : index
      %c0_32 = arith.constant 0 : index
      %c0_33 = arith.constant 0 : index
      %50 = vector.load %arg9[%c0_31, %c0_32, %c0_33] : memref<1x2x16xf32, #tpu.memory_space<vmem>>, vector<1x1x16xf32>
      %51 = vector.shape_cast %50 : vector<1x1x16xf32> to vector<1x16xf32>
      %52 = arith.addf %46, %51 : vector<1x16xf32>
      %c0_34 = arith.constant 0 : index
      %c1_35 = arith.constant 1 : index
      %c0_36 = arith.constant 0 : index
      %53 = vector.load %arg9[%c0_34, %c1_35, %c0_36] : memref<1x2x16xf32, #tpu.memory_space<vmem>>, vector<1x1x16xf32>
      %54 = vector.shape_cast %53 : vector<1x1x16xf32> to vector<1x16xf32>
      %55 = arith.addf %49, %54 : vector<1x16xf32>
      %c0_37 = arith.constant 0 : index
      %c0_38 = arith.constant 0 : index
      %c0_39 = arith.constant 0 : index
      %56 = vector.load %arg10[%c0_37, %c0_38, %c0_39] : memref<1x2x16xf32, #tpu.memory_space<vmem>>, vector<1x1x16xf32>
      %57 = vector.shape_cast %56 : vector<1x1x16xf32> to vector<1x16xf32>
      %58 = vector.shape_cast %52 : vector<1x16xf32> to vector<1x1x16xf32>
      tpu.vector_store %arg10[%c0_37, %c0_38, %c0_39], %58 {strides = array<i32>} : memref<1x2x16xf32, #tpu.memory_space<vmem>>, vector<1x1x16xf32>,
      %c0_40 = arith.constant 0 : index
      %c1_41 = arith.constant 1 : index
      %c0_42 = arith.constant 0 : index
      %59 = vector.load %arg10[%c0_40, %c1_41, %c0_42] : memref<1x2x16xf32, #tpu.memory_space<vmem>>, vector<1x1x16xf32>
      %60 = vector.shape_cast %59 : vector<1x1x16xf32> to vector<1x16xf32>
      %61 = vector.shape_cast %55 : vector<1x16xf32> to vector<1x1x16xf32>
      tpu.vector_store %arg10[%c0_40, %c1_41, %c0_42], %61 {strides = array<i32>} : memref<1x2x16xf32, #tpu.memory_space<vmem>>, vector<1x1x16xf32>,
    } else {
    }
    return
  }
  func.func @transform_0(%arg0: i32, %arg1: i32) -> i32 {
    %c0_i32 = arith.constant 0 : i32
    %c0_i32_0 = arith.constant 0 : i32
    return %c0_i32 : i32
  }
  func.func @transform_1(%arg0: i32, %arg1: i32) -> (i32, i32, i32) {
    %c0_i32 = arith.constant 0 : i32
    %c0_i32_0 = arith.constant 0 : i32
    %c0_i32_1 = arith.constant 0 : i32
    return %arg0, %c0_i32, %c0_i32_0 : i32, i32, i32
  }
  func.func @transform_2(%arg0: i32, %arg1: i32) -> (i32, i32, i32) {
    %c0_i32 = arith.constant 0 : i32
    %c0_i32_0 = arith.constant 0 : i32
    return %arg0, %arg1, %c0_i32 : i32, i32, i32
  }
  func.func @transform_3(%arg0: i32, %arg1: i32) -> (i32, i32, i32) {
    %c0_i32 = arith.constant 0 : i32
    %c0_i32_0 = arith.constant 0 : i32
    return %arg0, %c0_i32, %arg1 : i32, i32, i32
  }
  func.func @transform_4(%arg0: i32, %arg1: i32) -> (i32, i32) {
    %c0_i32 = arith.constant 0 : i32
    %c0_i32_0 = arith.constant 0 : i32
    %c0_i32_1 = arith.constant 0 : i32
    return %c0_i32, %c0_i32_0 : i32, i32
  }
  func.func @transform_5(%arg0: i32, %arg1: i32) -> (i32, i32) {
    %c0_i32 = arith.constant 0 : i32
    %c0_i32_0 = arith.constant 0 : i32
    %c0_i32_1 = arith.constant 0 : i32
    return %c0_i32, %c0_i32_0 : i32, i32
  }
  func.func @transform_6(%arg0: i32, %arg1: i32) -> (i32, i32) {
    %c0_i32 = arith.constant 0 : i32
    %c0_i32_0 = arith.constant 0 : i32
    %c0_i32_1 = arith.constant 0 : i32
    return %c0_i32, %c0_i32_0 : i32, i32
  }
  func.func @transform_7(%arg0: i32, %arg1: i32) -> (i32, i32, i32) {
    %c0_i32 = arith.constant 0 : i32
    %c0_i32_0 = arith.constant 0 : i32
    %c0_i32_1 = arith.constant 0 : i32
    return %arg0, %c0_i32, %c0_i32_0 : i32, i32, i32
  }
  func.func @transform_8(%arg0: i32, %arg1: i32) -> (i32, i32, i32) {
    %c0_i32 = arith.constant 0 : i32
    %c0_i32_0 = arith.constant 0 : i32
    %c0_i32_1 = arith.constant 0 : i32
    return %arg0, %c0_i32, %c0_i32_0 : i32, i32, i32
  }
}

</mosaic_0001>

<bundles_post_ra>
// kernel: tpu_custom_call.1
= control target key start
LH: loop header
LB: loop body
LE: loop exit
PB: predicated region body
PF: predicated region fallthrough
CT: control target
= control target key end

     0   :  { %s2053_s0 = inlined_call_operand.hbm [shape: f32[3], index: 0, kind: input, shape index: {}]   ;;  %s2054_s1 = inlined_call_operand.hbm [shape: f32[2,32,128], index: 1, kind: input, shape index: {}]   ;;  %s2055_s2 = inlined_call_operand.hbm [shape: f32[2,16,16], index: 2, kind: input, shape index: {}]   ;;  %s2056_s3 = inlined_call_operand.vmem [shape: f32[2,1,16], index: 3, kind: input, shape index: {}]   ;;  %s2057_s4 = inlined_call_operand.hbm [shape: f32[128,128], index: 4, kind: input, shape index: {}]   ;;  %s2058_s5 = inlined_call_operand.vmem [shape: f32[1,256], index: 5, kind: input, shape index: {}]   ;;  %s2059_s6 = inlined_call_operand.hbm [shape: f32[128,128], index: 6, kind: input, shape index: {}]   ;;  %s2060_s7 = inlined_call_operand.vmem [shape: f32[2,2,16], index: 7, kind: input, shape index: {}]   ;;  %s2061_s8 = inlined_call_operand.hbm [shape: f32[2,2,16], index: 8, kind: output, shape index: {}]  }
   0x1   :  { %2072 = sst [smem:[#allocation28_spill]] %s2053_s0 }
   0x2   :  { %2073 = sst [smem:[#allocation29_spill]] %s2054_s1 }
   0x3   :  { %2074 = sst [smem:[#allocation30_spill]] %s2057_s4 }
   0x4   :  { %2075 = sst [smem:[#allocation31_spill]] %s2059_s6 }
   0x5   :  { %13 = vsyncpa [#allocation8], 0 }
   0x6   :  { %14 = vsyncpa [#allocation6], 0 }
   0x7   :  { %16 = vsyncpa [#allocation6 + $0x1], 0 }
   0x8   :  { %17 = vsyncpa [#allocation11], 0 }
   0x9   :  { %19 = vsyncpa [#allocation11 + $0x1], 0 }
   0xa   :  { %20 = vsyncpa [#allocation14], 0 }
   0xb   :  { %21 = vsyncpa [#allocation7], 0 }
   0xc   :  { %23 = vsyncpa [#allocation7 + $0x1], 0  ;;  %s1759_s27 = smov 0   ;;  %s1761_s28 = smov 0  }
   0xd   :  { %s1763_s29 = smov 0   ;;  %s1765_s30 = smov 0  }
   0xe   :  { %s1767_s9 = smov 0   ;;  %s1769_s10 = smov 0  }
   0xf LB: > { %2076 = sst [smem:[#allocation22_spill]] %s1682_s27  ;;  %s1790_s11 = sadd.s32 4294967295, %s1702_s10   ;;  %s1702_s10 = sphi %s1769_s10, %s29_s10   ;;  %s1698_s9 = sphi %s1767_s9, %s2105_s9   ;;  %s1694_s30 = sphi %s1765_s30, %s2104_s30   ;;  %s1690_s29 = sphi %s1763_s29, %s2100_s29   ;;  %s1686_s28 = sphi %s1761_s28, %s2103_s28   ;;  %s1682_s27 = sphi %s1759_s27, %s2102_s27  }
  0x10   : > { %2077 = sst [smem:[#allocation23_spill]] %s1690_s29  ;;  %s1209_s12 = sadd.s32 4294967294, %s1702_s10  }
  0x11   : > { %2078 = sst [smem:[#allocation24_spill]] %s1702_s10  ;;  %p82_p0 = scmp.ne.s32.totalorder %s1686_s28, %s1682_s27 }
  0x12   : > { %p83_p1 = scmp.eq.s32.totalorder %s1790_s11, 0  ;;  %p257_p3 = scmp.eq.s32.totalorder %s1209_s12, 1 }
  0x13   : > { %p1210_p5 = scmp.ge.s32.totalorder %s1702_s10, 1  ;;  %p264_p7 = scmp.lt.s32.totalorder %s1702_s10, 3 }
  0x14   : > { %p1799_p4 = por %p83_p1, %p82_p0  ;;  %p1804_p6 = por %p257_p3, %p82_p0 }
  0x15   : > { %p1809_p8 = pnand %p1210_p5, %p264_p7  ;;  %s1704_s16 = smov [#allocation12]  }
  0x16   : > { %s2080_s14 = scalar_select %p1804_p6, 1, 0 }
  0x17   : > { %s285_s17 = sshll.u32 %s1704_s16, 4  ;;  %p1399_p9 = pneg %p1809_p8  ;;  %s286_s17 = int_to_ptr.vmem [resolvable:$true] %s285_s17 }
  0x18   : > { %2081 = sst [smem:[#allocation25_spill]] %s2080_s14  ;;  %s1705_s19 = smov [#allocation13]  }
  0x19   : > { %p1818_p11 = pnand %p1399_p9, %p83_p1  ;;  %s301_s20 = sshll.u32 %s1705_s19, 4  ;;  %s302_s20 = int_to_ptr.vmem [resolvable:$true] %s301_s20 }
  0x1a   : > { %s1498_s21 = scalar_lea.vmem %s286_s17, 2048  ;;  %p1506_p5 = scmp.lt.s32.totalorder %s286_s17, %s286_s17 }
  0x1b   : > { %p1489_p12 = pneg %p1818_p11  ;;  %p1499_p13 = scmp.ne.s32.totalorder %s286_s17, %s1498_s21 }
  0x1c   : > { %p1507_p7 = scmp.lt.s32.totalorder %s1498_s21, %s1498_s21 }
  0x1d   : > { %p1501_p0 = pnand %p1499_p13, %p1489_p12 }
  0x1e   : > { %p1508_p10 = por %p1507_p7, %p1506_p5 }
  0x1f   : > { %p1502_p3 = pneg %p1501_p0 }
  0x21   : > { %p1509_p2 = pnand %p1508_p10, %p1502_p3 }
  0x23   : > { %1512 = shalt.err (!%p1509_p2)
}
  0x24   : > { %s2062_s22 = smov 128   ;;  %s2064_s23 = smov 8  }
  0x25   : > { %s2084_s4 = sld [smem:[#allocation30_spill]]  ;;  %s1708_s26 = smov [#allocation5]  }
  0x26   : > { %s2085_s0 = sld [smem:[#allocation28_spill]]  ;;  %s1535_s19 = scalar_lea.vmem %s302_s20, 2048 }
  0x27   : > { %p1536_p2 = scmp.ne.s32.totalorder %s302_s20, %s1535_s19  ;;  %p1543_p13 = scmp.lt.s32.totalorder %s302_s20, %s302_s20 }
  0x28   : > { %p1544_p0 = scmp.lt.s32.totalorder %s1535_s19, %s1535_s19 }
  0x29   : > { %p1538_p9 = pnand %p1536_p2, %p1489_p12 }
  0x2a   : > { %p1545_p3 = por %p1544_p0, %p1543_p13 }
  0x2b   : > { %1405 = dma.hbm_to_vmem [thread:$0]  (!%p1818_p11), %s2084_s4, 2048, %s286_s17, [#allocation11], %s2062_s22, %s2062_s22, %s2064_s23  }
  0x2c   : > { %1402 = dma.hbm_to_smem (!%p1818_p11), %s2085_s0, 16, %s1708_s26, [#allocation8]  }
  0x2d   : > { %p1539_p10 = pneg %p1538_p9 }
  0x2f   : > { %p1546_p5 = pnand %p1545_p3, %p1539_p10 }
  0x31   : > { %1549 = shalt.err (!%p1546_p5)
}
  0x32   : > { %s2086_s6 = sld [smem:[#allocation31_spill]]  ;;  %s69_s24 = sadd.s32 1, %s1690_s29 }
  0x33   : > { %s41_s18 = sadd.s32 1, %s1698_s9  ;;  %p76_p12 = scmp.ne.s32.totalorder %s1690_s29, %s1686_s28 }
  0x34   : > { %p43_p7 = scmp.ge.s32.totalorder %s41_s18, 2  ;;  %p77_p2 = scmp.eq.s32.totalorder %s1702_s10, 0 }
  0x35   : > { %p2087_p9 = scmp.eq.s32.totalorder %s1790_s11, 1  ;;  %p1423_p13 = scmp.lt.s32.totalorder %s1702_s10, 2 }
  0x36   : > { %s2107_s18 = smov (%p43_p7, %s41_s18), 0  ;;  %p78_p0 = por %p77_p2, %p76_p12 }
  0x37   : > { %p1858_p10 = por %p2087_p9, %p76_p12  ;;  %2089 = sst [smem:[#allocation26_spill]] %s2107_s18 }
  0x38   : > { %1408 = dma.hbm_to_vmem [thread:$0]  (!%p1818_p11), %s2086_s6, 2048, %s302_s20, [#allocation14], %s2062_s22, %s2062_s22, %s2064_s23  }
  0x39   : > { %s1866_s26 = sand.u32 1, %s1690_s29   ;;  %s66_s20 = ssub.s32 %s1698_s9, %s2107_s18 }
  0x3a   : > { %p67_p11 = scmp.eq.s32.totalorder %s66_s20, 0  ;;  %s1215_s12 = sshll.u32 %s1866_s26, 5 }
  0x3b   : > { %s1239_s16 = sshll.u32 %s1698_s9, 9  ;;  %s2091_s1 = sld [smem:[#allocation29_spill]] }
  0x3c   : > { %s1873_s19 = scalar_select %p67_p11, %s1690_s29, %s69_s24  }
  0x3d   : > { %s319_s23 = scalar_lea.vmem [#allocation9], %s1215_s12  ;;  %p1880_p3 = pnand %p1423_p13, %p78_p0 }
  0x3e   : > { %2090 = sst [smem:[#allocation27_spill]] %s1873_s19  ;;  %s326_s0 = sshll.u32 %s319_s23, 4  ;;  %s327_s0 = int_to_ptr.vmem [resolvable:$true] %s326_s0 }
  0x3f   : > { %s336_s6 = sand.u32 1, %s1702_s10   ;;  %s1218_s20 = sshll.u32 %s1866_s26, 4 }
  0x40   : > { %s316_s18 = scalar_lea.sflag [#allocation6], %s1866_s26  ;;  %p1552_p5 = pneg %p1880_p3 }
  0x41   : > { %s325_s22 = scalar_lea.hbm %s2091_s1, %s1239_s16  ;;  %s1563_s24 = scalar_lea.vmem %s327_s0, 512 }
  0x42   : > { %p1564_p12 = scmp.ne.s32.totalorder %s327_s0, %s1563_s24  ;;  %s1709_s23 = smov [#allocation9]  }
  0x43   : > { %s1568_s12 = sshll.u32 %s1709_s23, 4  ;;  %s1569_s12 = int_to_ptr.vmem [resolvable:$false] %s1568_s12 }
  0x44   : > { %p1566_p7 = pnand %p1564_p12, %p1552_p5  ;;  %s1570_s16 = scalar_lea.vmem %s1569_s12, 1024 }
  0x45   : > { %p1571_p9 = scmp.lt.s32.totalorder %s327_s0, %s1569_s12  ;;  %p1572_p13 = scmp.lt.s32.totalorder %s1570_s16, %s1563_s24 }
  0x46   : > { %p1567_p2 = pneg %p1566_p7 }
  0x47   : > { %p1573_p0 = por %p1572_p13, %p1571_p9 }
  0x49   : > { %p1574_p11 = pnand %p1573_p0, %p1567_p2 }
  0x4b   : > { %1577 = shalt.err (!%p1574_p11)
}
  0x4c   : > { %s2093_s26 = smov 8   ;;  %s2094_s17 = smov 128  }
  0x4d   : > { %1412 = dma.hbm_to_vmem [thread:$0]  (!%p1880_p3), %s325_s22, 512, %s327_s0, %s316_s18, %s2094_s17, %s2094_s17, %s2093_s26  }
  0x4e   : > { %s1240_s21 = sshll.u32 %s1698_s9, 8  ;;  %s340_s29 = scalar_lea.vmem [#allocation10], %s1218_s20 }
  0x4f   : > { %s348_s23 = scalar_lea.hbm %s2055_s2, %s1240_s21  ;;  %s349_s10 = sshll.u32 %s340_s29, 4  ;;  %s350_s10 = int_to_ptr.vmem [resolvable:$true] %s349_s10 }
  0x50   : > { %s337_s24 = scalar_lea.sflag [#allocation11], %s336_s6  ;;  %s1591_s12 = scalar_lea.vmem %s350_s10, 256 }
  0x51   : > { %p1592_p12 = scmp.ne.s32.totalorder %s350_s10, %s1591_s12  ;;  %s1710_s16 = smov [#allocation10]  }
  0x52   : > { %s1596_s14 = sshll.u32 %s1710_s16, 4  ;;  %s1597_s14 = int_to_ptr.vmem [resolvable:$false] %s1596_s14 }
  0x53   : > { %p1594_p7 = pnand %p1592_p12, %p1552_p5  ;;  %s1598_s27 = scalar_lea.vmem %s1597_s14, 512 }
  0x54   : > { %p1599_p9 = scmp.lt.s32.totalorder %s350_s10, %s1597_s14  ;;  %p1600_p13 = scmp.lt.s32.totalorder %s1598_s27, %s1591_s12 }
  0x55   : > { %p1595_p2 = pneg %p1594_p7 }
  0x56   : > { %p1601_p0 = por %p1600_p13, %p1599_p9 }
  0x58   : > { %p1602_p11 = pnand %p1601_p0, %p1595_p2 }
  0x5a   : > { %1605 = shalt.err (!%p1602_p11)
}
  0x5b   : > { %1415 = dma.hbm_to_vmem [thread:$0]  (!%p1880_p3), %s348_s23, 256, %s350_s10, %s337_s24, %s2094_s17, %s2094_s17, %s2093_s26  }
  0x5c   : > { %377 = sbr.rel (%p1809_p8) target bundleno = 1198 (0x4ae), region = 52 }
  0x61   : > { %1657 = dma.done.wait (%p83_p1), [#allocation8], 16  }
  0x62   : > { %1659 = vsyncadd (%p83_p1), [#allocation8], 4294967280  ;;  %s1916_s0 = sand.u32 1, %s1686_s28  }
  0x63   : > { %s1223_s1 = sshll.u32 %s1916_s0, 5  ;;  %s384_s4 = scalar_lea.sflag [#allocation6], %s1916_s0 }
  0x64   : > { %s1920_s6 = scalar_lea.vmem [#allocation9], %s1223_s1 }
  0x65   : > { %1661 = dma.done.wait (%p1799_p4), %s384_s4, 512  }
  0x66   : > { %1663 = vsyncadd (%p1799_p4), %s384_s4, 4294966784  ;;  %s392_s27 = sand.u32 1, %s1790_s11   ;;  %s1224_s29 = sshll.u32 %s1916_s0, 4 }
  0x67   : > { %s393_s10 = scalar_lea.sflag [#allocation11], %s392_s27  ;;  %s1928_s14 = scalar_lea.vmem [#allocation10], %s1224_s29 }
  0x68   : > { %1665 = dma.done.wait (%p1799_p4), %s393_s10, 256  }
  0x69   : > { %1667 = vsyncadd (%p1799_p4), %s393_s10, 4294967040 }
  0x6a   : > { %1669 = dma.done.wait (%p83_p1), [#allocation11], 2048  }
  0x6b   : > { %1671 = vsyncadd (%p83_p1), [#allocation11], 4294965248 }
  0x6c   : > { %1673 = dma.done.wait (%p83_p1), [#allocation14], 2048  }
  0x6d   : > { %1675 = vsyncadd (%p83_p1), [#allocation14], 4294965248 }
  0x6e   : > { %409 = sfence }
  0x6f   : > { %v490_v0 = vld [vmem:[#allocation12 + $0x78] sm:$0xff]  ;;  %v489_v1 = vld [vmem:[#allocation12 + $0x70] sm:$0xff]  ;;  %v488_v2 = vld [vmem:[#allocation12 + $0x68] sm:$0xff]  ;;  %v1711_v20 = vmov 0.0   ;;  %vm599_vm0 = vcmask 130048   ;;  %vm1712_vm1 = vmmov 0   ;;  %v589_v32 = vlaneseq }
  0x70   : > { %1287 = vmatprep.subr.mxu0 %v490_v0  ;;  %v487_v3 = vld [vmem:[#allocation12 + $0x60] sm:$0xff]  ;;  %v486_v5 = vld [vmem:[#allocation12 + $0x58] sm:$0xff]  ;;  %v485_v6 = vld [vmem:[#allocation12 + $0x50] sm:$0xff]  ;;  %580 = vst [vmem:[#allocation4] sm:$0x1] %v1711_v20  ;;  %1332 = vmatprep.subr.mxu1 %v1711_v20  ;;  %s464_s11 = sld [smem:[#allocation5]] }
  0x71   : > { %1288 = vmatpush3.msra.mxu0 %v490_v0  ;;  %v471_v4 = vld [vmem:[%s1920_s6] sm:$0xff]  ;;  %v484_v7 = vld [vmem:[#allocation12 + $0x48] sm:$0xff]  ;;  %v482_v9 = vld [vmem:[#allocation12 + $0x38] sm:$0xff]  ;;  %1364 = vmatprep.mubr.msk.f32.mxu1 %vm1712_vm1, %v1711_v20  ;;  %v590_v33 = vshrl.u32 %v589_v32, 7  ;;  %p454_p1 = scmp.lt.s32.totalorder %s1694_s30, 1  ;;  %s1230_s26 = sld [smem:[#allocation5 + $0x2]] }
  0x72   : > { %1289 = vmatprep.subr.mxu0 %v489_v1  ;;  %1319 = vmatprep.mubr.f32.mxu0 %v471_v4  ;;  %v483_v8 = vld [vmem:[#allocation12 + $0x40] sm:$0xff]  ;;  %v481_v10 = vld [vmem:[#allocation12 + $0x30] sm:$0xff]  ;;  %v480_v11 = vld [vmem:[#allocation12 + $0x28] sm:$0xff]  ;;  %s1229_s17 = sld [smem:[#allocation5 + $0x1]]  ;;  %s1227_s16 = sshll.u32 %s1916_s0, 1  ;;  %vm1030_vm6 = vcmask 122880  }
  0x73   : > { %1290 = vmatpush3.msra.mxu0 %v489_v1  ;;  %v479_v12 = vld [vmem:[#allocation12 + $0x20] sm:$0xff]  ;;  %v478_v13 = vld [vmem:[#allocation12 + $0x18] sm:$0xff]  ;;  %v477_v14 = vld [vmem:[#allocation12 + $0x10] sm:$0xff]  ;;  %v591_v34 = vsub.s32 0, %v590_v33  ;;  %v595_v35 = vsub.s32 1, %v590_v33  ;;  %s1972_s22 = scalar_select %p454_p1, %s1694_s30, 1 }
  0x74   : > { %1291 = vmatprep.subr.mxu0 %v488_v2  ;;  %v476_v15 = vld [vmem:[#allocation12 + $0x8] sm:$0xff]  ;;  %v475_v16 = vld [vmem:[#allocation12] sm:$0xff]  ;;  %v473_v18 = vld [vmem:[%s1920_s6 + $0x10] sm:$0xff]  ;;  %s452_s1 = scalar_lea.vmem [#allocation15], %s1227_s16  ;;  %s1236_s4 = sshll.u32 %s1694_s30, 5 }
  0x75   : > { %1292 = vmatpush3.msra.mxu0 %v488_v2  ;;  %v472_v17 = vld [vmem:[%s1920_s6 + $0x8] sm:$0xff]  ;;  %v474_v19 = vld [vmem:[%s1920_s6 + $0x18] sm:$0xff]  ;;  %v581_v25 = vld [vmem:[%s1928_s14] sm:$0xff]  ;;  %s459_s20 = scalar_lea.vmem %s2056_s3, %s1972_s22  ;;  %s1228_s21 = sshll.u32 %s1972_s22, 1 }
  0x76   : > { %1293 = vmatprep.subr.mxu0 %v487_v3  ;;  %v582_v26 = vld [vmem:[%s1928_s14 + $0x8] sm:$0xff]  ;;  %v809_v28 = vld [vmem:[#allocation13 + $0x70] sm:$0xff]  ;;  %v807_v30 = vld [vmem:[#allocation13 + $0x60] sm:$0xff]  ;;  %v1974_v43 = vstv %s464_s11  ;;  %s463_s12 = scalar_lea.vmem %s2060_s7, %s1228_s21  ;;  %s1047_s6 = sshll.u32 %s452_s1, 4  ;;  %s1048_s6 = int_to_ptr.vmem [resolvable:$true] %s1047_s6 }
  0x77   : > { %1294 = vmatpush3.msra.mxu0 %v487_v3  ;;  %v810_v27 = vld [vmem:[#allocation13 + $0x78] sm:$0xff]  ;;  %v808_v29 = vld [vmem:[#allocation13 + $0x68] sm:$0xff]  ;;  %v707_v51 = vld [vmem:[%s459_s20] sm:$0x1]  ;;  %s1045_s10 = scalar_lea.hbm %s2061_s8, %s1236_s4  ;;  %s1034_s14 = scalar_lea.sflag [#allocation7], %s1916_s0 }
  0x78   : > { %1295 = vmatprep.subr.mxu0 %v486_v5  ;;  %1333 = vmatpush3.xpose.msra.mxu1 %v810_v27  ;;  %v806_v31 = vld [vmem:[#allocation13 + $0x58] sm:$0xff]  ;;  %v805_v53 = vld [vmem:[#allocation13 + $0x50] sm:$0xff]  ;;  %v804_v54 = vld [vmem:[#allocation13 + $0x48] sm:$0xff]  ;;  %s1606_s11 = scalar_lea.vmem %s1048_s6, 32  ;;  %s1713_s13 = smov [#allocation15]  }
  0x79   : > { %1296 = vmatpush3.msra.mxu0 %v486_v5  ;;  %1334 = vmatprep.subr.mxu1 %v1711_v20  ;;  %v587_v36 = vld [vmem:[%s2058_s5] sm:$0x3]  ;;  %v803_v55 = vld [vmem:[#allocation13 + $0x40] sm:$0xff]  ;;  %v800_v58 = vld [vmem:[#allocation13 + $0x28] sm:$0xff]  ;;  %v787_v5 = vstv %s1230_s26  ;;  %p1607_p4 = scmp.ne.s32.totalorder %s1048_s6, %s1606_s11  ;;  %s1610_s15 = sshll.u32 %s1713_s13, 4  ;;  %s1611_s15 = int_to_ptr.vmem [resolvable:$false] %s1610_s15 }
  0x7a   : > { %1297 = vmatprep.subr.mxu0 %v485_v6  ;;  %v592_v37 = vrot.slane %v587_v36, %v591_v34  ;;  %v1967_v38 = vrot.slane %v587_v36, %v595_v35  ;;  %v802_v56 = vld [vmem:[#allocation13 + $0x38] sm:$0xff]  ;;  %v801_v57 = vld [vmem:[#allocation13 + $0x30] sm:$0xff]  ;;  %v799_v59 = vld [vmem:[#allocation13 + $0x20] sm:$0xff]  ;;  %s1612_s30 = scalar_lea.vmem %s1611_s15, 64  ;;  %p1613_p5 = scmp.lt.s32.totalorder %s1048_s6, %s1611_s15 }
  0x7b   : > { %1298 = vmatpush3.msra.mxu0 %v485_v6  ;;  %v798_v60 = vld [vmem:[#allocation13 + $0x18] sm:$0xff]  ;;  %v797_v61 = vld [vmem:[#allocation13 + $0x10] sm:$0xff]  ;;  %v796_v62 = vld [vmem:[#allocation13 + $0x8] sm:$0xff]  ;;  %p1608_p8 = pnand %p1607_p4, %p1858_p10  ;;  %p1614_p12 = scmp.lt.s32.totalorder %s1612_s30, %s1606_s11 }
  0x7c   : > { %1299 = vmatprep.subr.mxu0 %v484_v7  ;;  %1335 = vmatpush3.xpose.msra.mxu1 %v809_v28  ;;  %v795_v63 = vld [vmem:[#allocation13] sm:$0xff]  ;;  %v706_v1 = vld [vmem:[#allocation4] sm:$0x1] }
  0x7d   : > { %1300 = vmatpush3.msra.mxu0 %v484_v7  ;;  %1336 = vmatprep.subr.mxu1 %v1711_v20  ;;  %p1609_p3 = pneg %p1608_p8  ;;  %p1615_p7 = por %p1614_p12, %p1613_p5 }
  0x7e   : > { %1301 = vmatprep.subr.mxu0 %v483_v8 }
  0x7f   : > { %1302 = vmatpush3.msra.mxu0 %v483_v8  ;;  %p1616_p2 = pnand %p1615_p7, %p1609_p3 }
  0x80   : > { %1303 = vmatprep.subr.mxu0 %v482_v9  ;;  %1337 = vmatpush3.xpose.msra.mxu1 %v808_v29 }
  0x81   : > { %1304 = vmatpush3.msra.mxu0 %v482_v9  ;;  %1338 = vmatprep.subr.mxu1 %v1711_v20 }
  0x82   : > { %1305 = vmatprep.subr.mxu0 %v481_v10 }
  0x83   : > { %1306 = vmatpush3.msra.mxu0 %v481_v10 }
  0x84   : > { %1307 = vmatprep.subr.mxu0 %v480_v11  ;;  %1339 = vmatpush3.xpose.msra.mxu1 %v807_v30 }
  0x85   : > { %1308 = vmatpush3.msra.mxu0 %v480_v11  ;;  %1340 = vmatprep.subr.mxu1 %v1711_v20 }
  0x86   : > { %1309 = vmatprep.subr.mxu0 %v479_v12 }
  0x87   : > { %1310 = vmatpush3.msra.mxu0 %v479_v12 }
  0x88   : > { %1311 = vmatprep.subr.mxu0 %v478_v13  ;;  %1341 = vmatpush3.xpose.msra.mxu1 %v806_v31 }
  0x89   : > { %1312 = vmatpush3.msra.mxu0 %v478_v13  ;;  %1342 = vmatprep.subr.mxu1 %v1711_v20 }
  0x8a   : > { %1313 = vmatprep.subr.mxu0 %v477_v14 }
  0x8b   : > { %1314 = vmatpush3.msra.mxu0 %v477_v14 }
  0x8c   : > { %1315 = vmatprep.subr.mxu0 %v476_v15  ;;  %1343 = vmatpush3.xpose.msra.mxu1 %v805_v53 }
  0x8d   : > { %1316 = vmatpush3.msra.mxu0 %v476_v15  ;;  %1344 = vmatprep.subr.mxu1 %v1711_v20 }
  0x8e   : > { %1317 = vmatprep.subr.mxu0 %v475_v16 }
  0x8f   : > { %1318 = vmatpush3.msra.mxu0 %v475_v16 }
  0x90   : > { %1320 = vmatmul.mubr.f32.vlgmr.msra.gmra.mxu0 %v472_v17  ;;  %1345 = vmatpush3.xpose.msra.mxu1 %v804_v54  ;;  %v885_v17 = vstv %s1229_s17 }
  0x91   : > { %1322 = vmatprep.mubr.f32.mxu0 %v473_v18  ;;  %1346 = vmatprep.subr.mxu1 %v1711_v20 }
  0x94   : > { %1323 = vmatmul.mubr.f32.gmra.mxu0 %v474_v19  ;;  %1347 = vmatpush3.xpose.msra.mxu1 %v803_v55  ;;  %v1026_v19 = vld [vmem:[%s463_s12] sm:$0x1] }
  0x95   : > { %670 = vmatprep.mubr.f32.mxu0 %v1711_v20  ;;  %1348 = vmatprep.subr.mxu1 %v1711_v20 }
  0x98   : > { %1349 = vmatpush3.xpose.msra.mxu1 %v802_v56 }
  0x99   : > { %1350 = vmatprep.subr.mxu1 %v1711_v20 }
  0x9c   : > { %1351 = vmatpush3.xpose.msra.mxu1 %v801_v57 }
  0x9d   : > { %1352 = vmatprep.subr.mxu1 %v1711_v20 }
  0xa0   : > { %1353 = vmatpush3.xpose.msra.mxu1 %v800_v58 }
  0xa1   : > { %1354 = vmatprep.subr.mxu1 %v1711_v20 }
  0xa4   : > { %1355 = vmatpush3.xpose.msra.mxu1 %v799_v59 }
  0xa5   : > { %1356 = vmatprep.subr.mxu1 %v1711_v20 }
  0xa8   : > { %1357 = vmatpush3.xpose.msra.mxu1 %v798_v60 }
  0xa9   : > { %1358 = vmatprep.subr.mxu1 %v1711_v20 }
  0xac   : > { %1359 = vmatpush3.xpose.msra.mxu1 %v797_v61 }
  0xad   : > { %1360 = vmatprep.subr.mxu1 %v1711_v20 }
  0xb0   : > { %1361 = vmatpush3.xpose.msra.mxu1 %v796_v62 }
  0xb1   : > { %1362 = vmatprep.subr.mxu1 %v1711_v20 }
  0xb4   : > { %1363 = vmatpush3.xpose.msra.mxu1 %v795_v63 }
 0x150   : > { %v1321_v21 = vpop.f32.mrf.mxu0 }
 0x152   : > { %v557_v22 = vpop.f32.mrf.mxu0 }
 0x154   : > { %v1324_v23 = vpop.f32.mrf.mxu0 }
 0x155   : > { %634 = vmatprep.subr.mxu0 %v1324_v23 }
 0x156   : > { %v567_v24 = vpop.f32.mrf.mxu0  ;;  %635 = vmatpush1.msra.mxu0 %v1321_v21 }
 0x157   : > { %636 = vmatprep.subr.mxu0 %v567_v24  ;;  %v1028_v24 = vld [vmem:[%s463_s12 + $0x1] sm:$0x1] }
 0x158   : > { %637 = vmatpush1.msra.mxu0 %v557_v22 }
 0x159   : > { %1231 = vmatmul.mubr.msk.f32.vlgmr.msra.gmra.mxu0 %vm599_vm0, %v581_v25  ;;  %1325 = vmatprep.subr.mxu0 %v1711_v20 }
 0x15a   : > { %676 = vmatprep.mubr.f32.mxu0 %v1711_v20 }
 0x15d   : > { %1232 = vmatmul.mubr.msk.f32.gmra.mxu0 %vm599_vm0, %v582_v26 }
 0x15e   : > { %1329 = vmatprep.mubr.msk.f32.mxu0 %vm1712_vm1, %v1711_v20 }
 0x219   : > { %v672_v39 = vpop.f32.mrf.mxu0 }
 0x21a   : > { %v673_v41 = vadd.f32 %v672_v39, %v592_v37 }
 0x21b   : > { %v674_v40 = vpop.f32.mrf.mxu0 }
 0x21c   : > { %v675_v42 = vadd.f32 %v674_v40, %v1967_v38  ;;  %v688_v47 = vmul.f32 %v1974_v43, %v673_v41  ;;  %vm683_vm4 = vcmp.gt.f32.partialorder %v673_v41, 0.0 }
 0x21d   : > { %v678_v44 = vpop.f32.mrf.mxu0 }
 0x21e   : > { %vm684_vm2 = vcmp.gt.f32.partialorder %v675_v42, 0.0  ;;  %v689_v45 = vmul.f32 %v1974_v43, %v675_v42  ;;  %v679_v46 = vadd.f32 %v678_v44, %v592_v37  ;;  %v692_v52 = vsel %vm683_vm4, %v673_v41, %v688_v47 }
 0x21f   : > { %v680_v0 = vpop.f32.mrf.mxu0 }
 0x220   : > { %vm685_vm3 = vcmp.gt.f32.partialorder %v679_v46, 0.0  ;;  %v690_v48 = vmul.f32 %v1974_v43, %v679_v46  ;;  %v1983_v49 = vsel %vm684_vm2, %v675_v42, %v689_v45  ;;  %v681_v12 = vadd.f32 %v680_v0, %v1967_v38 }
 0x222   : > { %v694_v50 = vsel %vm685_vm3, %v679_v46, %v690_v48  ;;  %v691_v13 = vmul.f32 %v1974_v43, %v681_v12  ;;  %vm686_vm5 = vcmp.gt.f32.partialorder %v681_v12, 0.0 }
 0x223   : > { %1326 = vmatpush3.msra.mxu0 %v694_v50 }
 0x224   : > { %1327 = vmatprep.subr.mxu0 %v1711_v20  ;;  %v695_v15 = vsel %vm686_vm5, %v681_v12, %v691_v13 }
 0x225   : > { %1328 = vmatpush3.msra.mxu0 %v692_v52 }
 0x226   : > { %1330 = vmatmul.mubr.msk.f32.vlgmr.msra.gmra.mxu0 %vm599_vm0, %v707_v51  ;;  %1367 = vmatprep.subr.mxu0 %v1711_v20 }
 0x227   : > { %1368 = vmatpush3.xpose.msra.mxu0 %v694_v50  ;;  %1371 = vmatprep.mubr.msk.f32.mxu0 %vm1712_vm1, %v1711_v20 }
 0x228   : > { %1369 = vmatprep.subr.mxu0 %v1711_v20 }
 0x22b   : > { %1370 = vmatpush3.xpose.msra.mxu0 %v692_v52 }
 0x22c   : > { %1374 = vmatprep.subr.mxu0 %v1711_v20 }
 0x2e6   : > { %v777_v2 = vpop.f32.mrf.mxu0 }
 0x2e7   : > { %v781_v3 = vadd.f32 %v777_v2, %v706_v1 }
 0x2e8   : > { %v1331_v4 = vpop.f32.mrf.mxu0 }
 0x2e9   : > { %782 = vst [vmem:[#allocation4] sm:$0x1] %v781_v3 }
 0x2f0   : > { %v786_v6 = vld [vmem:[#allocation4] sm:$0x1] }
 0x2f1   : > { %v788_v7 = vmul.f32 %v787_v5, %v786_v6 }
 0x2f3   : > { %v1234_v8 = vmul.f32 -1.442695, %v788_v7 }
 0x2f5   : > { %1483 = vpow2.f32 %v1234_v8 }
 0x302   : > { %v1484_v9 = vpop.eup %1483 }
 0x303   : > { %v792_v10 = vadd.f32 1.0, %v1484_v9 }
 0x305   : > { %1485 = vrcp.f32 %v792_v10 }
 0x312   : > { %v1486_v11 = vpop.eup %1485 }
 0x313   : > { %1365 = vmatmul.mubr.f32.vlgmr.msra.gmra.mxu1 %v1486_v11 }
 0x3d3   : > { %v877_v14 = vpop.f32.mrf.mxu1 }
 0x3d4   : > { %1372 = vmatmul.mubr.f32.vlgmr.msra.gmra.mxu0 %v877_v14 }
 0x3d5   : > { %1375 = vmatpush3.xpose.msra.mxu0 %v695_v15  ;;  %v1366_v16 = vpop.f32.mrf.mxu1  ;;  %1378 = vmatprep.mubr.msk.f32.mxu0 %vm1712_vm1, %v1711_v20 }
 0x3d6   : > { %1376 = vmatprep.subr.mxu0 %v1711_v20 }
 0x3d9   : > { %1377 = vmatpush3.xpose.msra.mxu0 %v1983_v49 }
 0x3dc   : > { %1379 = vmatmul.mubr.f32.vlgmr.msra.gmra.mxu0 %v877_v14 }
 0x494   : > { %v952_v18 = vpop.f32.mrf.mxu0 }
 0x495   : > { %v953_v21 = vadd.f32 %v952_v18, %v885_v17 }
 0x496   : > { %v1373_v22 = vpop.f32.mrf.mxu0 }
 0x497   : > { %v1027_v23 = vadd.f32 %v1026_v19, %v953_v21 }
 0x499   : > { %1031 = vst.msk [vmem:[%s452_s1] sm:$0x1] %vm1030_vm6, %v1027_v23 }
 0x49c   : > { %v1022_v20 = vpop.f32.mrf.mxu0 }
 0x49d   : > { %v1023_v25 = vadd.f32 %v1022_v20, %v885_v17 }
 0x49e   : > { %v1380_v26 = vpop.f32.mrf.mxu0 }
 0x49f   : > { %v1029_v27 = vadd.f32 %v1028_v24, %v1023_v25 }
 0x4a1   : > { %1032 = vst.msk [vmem:[%s452_s1 + $0x1] sm:$0x1] %vm1030_vm6, %v1029_v27 }
 0x4a2   : > { %1619 = shalt.err (!%p1616_p2)
}
 0x4a3   : > { %s1620_s22 = scalar_lea.hbm %s1045_s10, 32  ;;  %s1624_s19 = scalar_lea.hbm %s2061_s8, 64 }
 0x4a4   : > { %p1621_p9 = scmp.ne.s32.totalorder %s1045_s10, %s1620_s22  ;;  %p1625_p11 = scmp.lt.s32.totalorder %s1045_s10, %s2061_s8 }
 0x4a5   : > { %p1626_p1 = scmp.lt.s32.totalorder %s1624_s19, %s1620_s22 }
 0x4a6   : > { %p1622_p13 = pnand %p1621_p9, %p1858_p10 }
 0x4a7   : > { %p1627_p4 = por %p1626_p1, %p1625_p11 }
 0x4a8   : > { %p1623_p0 = pneg %p1622_p13 }
 0x4aa   : > { %p1628_p8 = pnand %p1627_p4, %p1623_p0 }
 0x4ac   : > { %1631 = shalt.err (!%p1628_p8)
}
 0x4ad   : > { %1397 = dma.vmem_to_hbm [thread:$0]  (%p1858_p10), %s1048_s6, 32, %s1045_s10, %s1034_s14  }
 0x4ae PF: > { %s2095_s17 = sld [smem:[#allocation22_spill]] }
 0x4af   : > { %s2097_s23 = sld [smem:[#allocation24_spill]] }
 0x4b4   : > { %s1059_s24 = sand.u32 1, %s2095_s17  }
 0x4b5   : > { %p2098_p3 = scmp.ge.s32.totalorder %s2097_s23, 2  ;;  %s1060_s12 = scalar_lea.sflag [#allocation7], %s1059_s24 }
 0x4b7   : > { %p1417_p5 = pnand %p2098_p3, %p1804_p6 }
 0x4b9   : > { %p1418_p12 = pneg %p1417_p5 }
 0x4bb   : > { %1677 = dma.done.wait (%p1418_p12), %s1060_s12, 32  }
 0x4bc   : > { %1679 = vsyncadd (%p1418_p12), %s1060_s12, 4294967264  ;;  %s29_s10 = sadd.s32 1, %s2097_s23   ;;  %s2099_s16 = sld [smem:[#allocation23_spill]] }
 0x4bd   : > { %p26_p7 = scmp.ge.s32.totalorder %s29_s10, 4   ;;  %s2100_s29 = sld [smem:[#allocation27_spill]] }
 0x4be   : > { %s2101_s25 = sld [smem:[#allocation26_spill]]  ;;  %s2102_s27 = smov %s1686_s28 }
 0x4bf   : > { %s2104_s30 = smov %s1698_s9 }
 0x4c0   :  { %28 = sbr.rel (!%p26_p7) target bundleno = 15 (0xf), region = 138 }
 0x4c2   : > { %s2103_s28 = smov %s2099_s16 }
 0x4c4   : > { %s2105_s9 = smov %s2101_s25 }
 0x4c5   :  { %1065 = vsyncpa [#allocation6], 1 }
 0x4c6   :  { %1067 = vsyncpa [#allocation6 + $0x1], 1 }
 0x4c7   :  { %1068 = vsyncpa [#allocation11], 1 }
 0x4c8   :  { %1070 = vsyncpa [#allocation11 + $0x1], 1 }
 0x4c9   :  { %1071 = vsyncpa [#allocation14], 1 }
 0x4ca   :  { %1072 = vsyncpa [#allocation7], 1 }
 0x4cb   :  { %1074 = vsyncpa [#allocation7 + $0x1], 1 }
 0x4cc   :  { %1075 = vsyncpa [#allocation8], 1 }
 0x4cd   :  { %1077 = vsyncpa [#allocation8 + $0x1], 1 }

</bundles_post_ra>
